<compile_context>
chip_gen: v6e
topology: v6e:2x2x1
jax: 0.10.0
libtpu: 0.0.40
codegen_flags: <defaults>
</compile_context>

<pallas_src>
import functools

import jax
import jax.numpy as jnp
from jax.experimental import pallas as pl
from jax.experimental.pallas import tpu as pltpu

_LANES = 128
# ~2 MiB per input per pipeline buffer: 2 inputs x 2 buffers x 2 MiB = 8 MiB
# of VMEM -> fits every generation (with the explicit 32 MiB limit below).
_TARGET_BLOCK_BYTES = 2 * 1024 * 1024
_SUBLANE_ALIGN = 16  # multiple of 16 is valid for f32 (8,128) and bf16 (16,128)


def _bce_tile_kernel(pred_ref, tgt_ref, partial_ref, *, rows_valid, block_rows,
                     mask_last):
    """Per-tile partial sum of numerically-stable BCE-with-logits.

    Reduces over sublanes only (cheap VPU adds), writing a lane-dense
    (1, 1, 128) partial-sum row per grid step. The cross-lane reduce and the
    mean happen in the wrapper. Only the final (partial) edge tile pays for a
    row mask, and only when rows % block_rows != 0.
    """
    i = pl.program_id(0)
    x = pred_ref[...].astype(jnp.float32)
    y = tgt_ref[...].astype(jnp.float32)
    # PyTorch BCEWithLogitsLoss formulation:
    #   loss = max(x, 0) - x*y + log(1 + exp(-|x|))
    per_elem = jnp.maximum(x, 0.0) - x * y + jnp.log1p(jnp.exp(-jnp.abs(x)))

    def _write(vals):
        # Sublane-only reduction -> lane-dense (1, 1, 128) partial sum.
        partial_ref[...] = jnp.sum(vals, axis=0)[None, None, :]

    if mask_last:
        last = pl.num_programs(0) - 1

        @pl.when(i != last)
        def _():
            _write(per_elem)

        @pl.when(i == last)
        def _():
            # Rows past the true row count are Pallas edge-block padding
            # (undefined contents) -> zero them before reducing.
            row_ids = (jax.lax.broadcasted_iota(jnp.int32, x.shape, 0)
                       + i * block_rows)
            _write(jnp.where(row_ids < rows_valid, per_elem, 0.0))
    else:
        _write(per_elem)


def _bce_with_logits_mean_pallas(prediction, target):
    n = prediction.size
    pred_flat = prediction.reshape(-1)
    tgt_flat = target.reshape(-1)

    # Lane-dense layout: view the flat data as (rows, 128). If size % 128 == 0
    # (the common large-tensor case) this is a free reshape / zero extra HBM
    # traffic. Otherwise pad ONLY the <128-element ragged tail; the prediction
    # pad value is a large negative logit so (with target padded to 0) padded
    # elements contribute exactly 0:  max(x,0)=0, x*y=0, log1p(exp(-1000))=0.
    rem = n % _LANES
    if rem:
        pad = _LANES - rem
        pred_flat = jnp.pad(pred_flat, (0, pad), constant_values=-1000.0)
        tgt_flat = jnp.pad(tgt_flat, (0, pad), constant_values=0.0)
    rows = pred_flat.size // _LANES
    pred2d = pred_flat.reshape(rows, _LANES)
    tgt2d = tgt_flat.reshape(rows, _LANES)

    itemsize = max(pred2d.dtype.itemsize, tgt2d.dtype.itemsize)
    target_rows = max(_SUBLANE_ALIGN, _TARGET_BLOCK_BYTES // (_LANES * itemsize))
    if rows < _SUBLANE_ALIGN:
        block_rows = rows  # block == full sublane extent (always legal)
    else:
        # Multiple of 16, never larger than the array -> last block is partial.
        block_rows = min(target_rows, (rows // _SUBLANE_ALIGN) * _SUBLANE_ALIGN)
    num_tiles = pl.cdiv(rows, block_rows)
    mask_last = (rows % block_rows) != 0

    kernel = functools.partial(_bce_tile_kernel, rows_valid=rows,
                               block_rows=block_rows, mask_last=mask_last)

    n_view = rows * _LANES
    in_bytes = (pred2d.dtype.itemsize + tgt2d.dtype.itemsize) * n_view
    cost = pl.CostEstimate(
        flops=5 * n_view,
        transcendentals=2 * n_view,          # exp + log1p per element
        bytes_accessed=in_bytes + 4 * num_tiles * _LANES,
    )

    partials = pl.pallas_call(
        kernel,
        out_shape=jax.ShapeDtypeStruct((num_tiles, 1, _LANES), jnp.float32),
        grid=(num_tiles,),
        in_specs=[
            pl.BlockSpec((block_rows, _LANES), lambda i: (i, 0)),
            pl.BlockSpec((block_rows, _LANES), lambda i: (i, 0)),
        ],
        out_specs=pl.BlockSpec((1, 1, _LANES), lambda i: (i, 0, 0)),
        compiler_params=pltpu.CompilerParams(
            dimension_semantics=("parallel",),   # independent tiles -> both TCs
            vmem_limit_bytes=32 * 1024 * 1024,   # keeps 2x2x2MiB buffers on v5e
        ),
        cost_estimate=cost,
    )(pred2d, tgt2d)

    # Final cross-lane / cross-tile reduce + mean (divide by the TRUE element
    # count) done by XLA in the wrapper — negligible cost.
    return jnp.sum(partials) * jnp.float32(1.0 / n)


def _reference(prediction, target):
    x = prediction.astype(jnp.float32)
    y = target.astype(jnp.float32)
    per_elem = jnp.maximum(x, 0.0) - x * y + jnp.log1p(jnp.exp(-jnp.abs(x)))
    return jnp.mean(per_elem)


def naive_triplet_loss(prediction, target, *, min_pallas_elements: int = 1 << 16):
    """Equivalent of NaiveTripletLoss().forward(prediction, target).

    For tiny inputs (size < min_pallas_elements, default 64K elements) a fused
    pure-JAX path is faster than any kernel launch; pass 0 to force the Pallas
    kernel regardless of size.
    """
    assert prediction.shape == target.shape
    if prediction.size < min_pallas_elements:
        return _reference(prediction, target)
    return _bce_with_logits_mean_pallas(prediction, target)


if __name__ == "__main__":
    key = jax.random.PRNGKey(0)
    k1, k2, k3, k4, k5, k6 = jax.random.split(key, 6)

    # 1) Module-shaped case: logits for batches of 3-trajectory ranking tuples.
    batch, ranking = 8, 3
    prediction = jax.random.normal(k1, (batch, ranking), dtype=jnp.float32)
    target = (jax.random.uniform(k2, (batch, ranking)) > 0.5).astype(jnp.float32)
    loss = naive_triplet_loss(prediction, target, min_pallas_elements=0)
    jax.block_until_ready(loss)
    ref = _reference(prediction, target)
    assert jnp.allclose(loss, ref, rtol=1e-5, atol=1e-6), (loss, ref)

    # 2) Ragged size (not a multiple of 128): exercises the <128-element lane
    #    pad (-1000 logit trick) and the single-tile (block == full rows) path.
    pred2 = jax.random.normal(k3, (500, ranking), dtype=jnp.float32)
    tgt2 = (jax.random.uniform(k4, (500, ranking)) > 0.5).astype(jnp.float32)
    loss2 = naive_triplet_loss(pred2, tgt2, min_pallas_elements=0)
    jax.block_until_ready(loss2)
    ref2 = _reference(pred2, tgt2)
    assert jnp.allclose(loss2, ref2, rtol=1e-5, atol=1e-6), (loss2, ref2)

    # 3) bf16 inputs with a multi-tile grid and a masked partial last tile
    #    (validates (16,128) bf16 block packing and edge-block masking).
    pred3 = jax.random.normal(k5, (64, 37), dtype=jnp.bfloat16)
    tgt3 = (jax.random.uniform(k6, (64, 37)) > 0.5).astype(jnp.bfloat16)
    loss3 = naive_triplet_loss(pred3, tgt3, min_pallas_elements=0)
    jax.block_until_ready(loss3)
    ref3 = _reference(pred3, tgt3)
    assert jnp.allclose(loss3, ref3, rtol=1e-3, atol=1e-3), (loss3, ref3)

    print("KERNEL_OK")
</pallas_src>

<mosaic_0001>
module attributes {stable_mosaic.version = 11 : i64} {
  func.func @_bce_tile_kernel(%arg0: i32, %arg1: memref<1x128xf32, #tpu.memory_space<vmem>>, %arg2: memref<1x128xf32, #tpu.memory_space<vmem>>, %arg3: memref<1x1x128xf32, #tpu.memory_space<vmem>>) attributes {dimension_semantics = [#tpu.dimension_semantics<parallel>], iteration_bounds = array<i64: 1>, scalar_prefetch = 0 : i64, scratch_operands = 0 : i64, tpu.core_type = #tpu.core_type<tc>, window_params = [{transform_indices = @transform_0, window_bounds = array<i64: 1, 128>}, {transform_indices = @transform_1, window_bounds = array<i64: 1, 128>}, {transform_indices = @transform_2, window_bounds = array<i64: 1, 1, 128>}]} {
    %c0 = arith.constant 0 : index
    %c0_0 = arith.constant 0 : index
    %0 = vector.load %arg1[%c0, %c0_0] : memref<1x128xf32, #tpu.memory_space<vmem>>, vector<1x128xf32>
    %c0_1 = arith.constant 0 : index
    %c0_2 = arith.constant 0 : index
    %1 = vector.load %arg2[%c0_1, %c0_2] : memref<1x128xf32, #tpu.memory_space<vmem>>, vector<1x128xf32>
    %cst = arith.constant 0.000000e+00 : f32
    %2 = vector.broadcast %cst : f32 to vector<1x128xf32>
    %3 = arith.maximumf %0, %2 : vector<1x128xf32>
    %4 = arith.mulf %0, %1 : vector<1x128xf32>
    %5 = arith.subf %3, %4 : vector<1x128xf32>
    %6 = math.absf %0 : vector<1x128xf32>
    %cst_3 = arith.constant 0.000000e+00 : f32
    %7 = vector.broadcast %cst_3 : f32 to vector<1x128xf32>
    %8 = arith.subf %7, %6 : vector<1x128xf32>
    %9 = math.exp %8 : vector<1x128xf32>
    %10 = math.log1p %9 : vector<1x128xf32>
    %11 = arith.addf %5, %10 : vector<1x128xf32>
    %cst_4 = arith.constant dense<0.000000e+00> : vector<128xf32>
    %12 = vector.multi_reduction <add>, %11, %cst_4 [0] : vector<1x128xf32> to vector<128xf32>
    %13 = vector.shape_cast %12 : vector<128xf32> to vector<1x1x128xf32>
    %c0_5 = arith.constant 0 : index
    %c0_6 = arith.constant 0 : index
    %c0_7 = arith.constant 0 : index
    %14 = vector.load %arg3[%c0_5, %c0_6, %c0_7] : memref<1x1x128xf32, #tpu.memory_space<vmem>>, vector<1x1x128xf32>
    tpu.vector_store %arg3[%c0_5, %c0_6, %c0_7], %13 {strides = array<i32>} : memref<1x1x128xf32, #tpu.memory_space<vmem>>, vector<1x1x128xf32>,
    return
  }
  func.func @transform_0(%arg0: i32) -> (i32, i32) {
    %c0_i32 = arith.constant 0 : i32
    %c0_i32_0 = arith.constant 0 : i32
    return %arg0, %c0_i32 : i32, i32
  }
  func.func @transform_1(%arg0: i32) -> (i32, i32) {
    %c0_i32 = arith.constant 0 : i32
    %c0_i32_0 = arith.constant 0 : i32
    return %arg0, %c0_i32 : i32, i32
  }
  func.func @transform_2(%arg0: i32) -> (i32, i32, i32) {
    %c0_i32 = arith.constant 0 : i32
    %c0_i32_0 = arith.constant 0 : i32
    %c0_i32_1 = arith.constant 0 : i32
    return %arg0, %c0_i32, %c0_i32_0 : i32, i32, i32
  }
}

</mosaic_0001>

<bundles_post_ra>
// kernel: tpu_custom_call.1
= control target key start
LH: loop header
LB: loop body
LE: loop exit
PB: predicated region body
PF: predicated region fallthrough
CT: control target
= control target key end

     0   :  { %7 = vsyncpa [#allocation3], 0  ;;  %s136_s0 = inlined_call_operand.hbm [shape: f32[1,128], index: 0, kind: input, shape index: {}]   ;;  %s137_s1 = inlined_call_operand.vmem [shape: f32[1,128], index: 1, kind: input, shape index: {}]   ;;  %s138_s2 = inlined_call_operand.hbm [shape: f32[1,1,128], index: 2, kind: output, shape index: {}]  }
   0x1   :  { %8 = vsyncpa [#allocation4], 0  ;;  %s110_s9 = smov [#allocation2]  }
   0x2   :  { %s15_s10 = sshll.u32 %s110_s9, 4  ;;  %s16_s10 = int_to_ptr.vmem [resolvable:$true] %s15_s10 }
   0x3   :  { %s74_s11 = scalar_lea.vmem %s16_s10, 16  ;;  %s78_s12 = scalar_lea.vmem %s16_s10, 32 }
   0x4   :  { %p75_p0 = scmp.ne.s32.totalorder %s16_s10, %s74_s11  ;;  %p79_p1 = scmp.lt.s32.totalorder %s16_s10, %s16_s10 }
   0x5   :  { %p80_p2 = scmp.lt.s32.totalorder %s78_s12, %s74_s11 }
   0x7   :  { %p81_p3 = por %p80_p2, %p79_p1 }
   0x9   :  { %p82_p4 = pnand %p81_p3, %p75_p0 }
   0xb   :  { %85 = shalt.err (!%p82_p4)
}
   0xc   :  { %18 = dma.hbm_to_vmem [thread:$0]  %s136_s0, 16, %s16_s10, [#allocation3]  }
   0xd   :  { %106 = dma.done.wait [#allocation3], 16  }
   0xe   :  { %107 = vsyncadd [#allocation3], 4294967280  ;;  %v24_v0 = vld [vmem:[#allocation2] sm:$0x1]  ;;  %s111_s0 = smov [#allocation5]  }
   0xf   :  { %v29_v1 = vand.u32 2147483647, %v24_v0  ;;  %v25_v7 = vld [vmem:[%s137_s1] sm:$0x1]  ;;  %v26_v9 = vmax.f32 %v24_v0, 0.0  ;;  %s51_s17 = sshll.u32 %s111_s0, 4  ;;  %s52_s17 = int_to_ptr.vmem [resolvable:$true] %s51_s17 }
  0x10   :  { %v27_v10 = vmul.f32 %v25_v7, %v24_v0  ;;  %s86_s18 = scalar_lea.vmem %s52_s17, 16  ;;  %s90_s19 = scalar_lea.vmem %s52_s17, 32 }
  0x11   :  { %v30_v2 = vsub.f32 0.0, %v29_v1  ;;  %p87_p5 = scmp.ne.s32.totalorder %s52_s17, %s86_s18  ;;  %p91_p6 = scmp.lt.s32.totalorder %s52_s17, %s52_s17 }
  0x12   :  { %v28_v14 = vsub.f32 %v26_v9, %v27_v10  ;;  %p92_p7 = scmp.lt.s32.totalorder %s90_s19, %s86_s18 }
  0x13   :  { %v31_v3 = vmul.f32 1.442695, %v30_v2 }
  0x14   :  { %p93_p8 = por %p92_p7, %p91_p6 }
  0x15   :  { %62 = vpow2.f32 %v31_v3 }
  0x16   :  { %p94_p9 = pnand %p93_p8, %p87_p5 }
  0x22   :  { %v63_v4 = vpop.eup %62 }
  0x23   :  { %v33_v5 = vadd.f32 1.0, %v63_v4  ;;  %v36_v6 = vmul.f32 -0.5, %v63_v4  ;;  %v39_v11 = vand.u32 2147483647, %v63_v4 }
  0x25   :  { %64 = vlog2.f32 %v33_v5  ;;  %v37_v8 = vadd.f32 1.0, %v36_v6  ;;  %vm40_vm0 = vcmp.lt.f32.partialorder %v39_v11, 0.0004427343 }
  0x27   :  { %v38_v12 = vmul.f32 %v63_v4, %v37_v8 }
  0x32   :  { %v65_v13 = vpop.eup %64 }
  0x33   :  { %v35_v15 = vmul.f32 0.6931472, %v65_v13 }
  0x35   :  { %v41_v16 = vsel %vm40_vm0, %v38_v12, %v35_v15 }
  0x36   :  { %v42_v17 = vadd.f32 %v41_v16, %v28_v14 }
  0x38   :  { %44 = vst [vmem:[#allocation5] sm:$0x1] %v42_v17 }
  0x39   :  { %97 = shalt.err (!%p94_p9)
}
  0x3a   :  { %54 = dma.vmem_to_hbm [thread:$0]  %s52_s17, 16, %s138_s2, [#allocation4]  }
  0x3b   :  { %108 = dma.done.wait [#allocation4], 16  }
  0x3c   :  { %109 = vsyncadd [#allocation4], 4294967280 }
  0x3d   :  { %58 = vsyncpa [#allocation3], 1 }
  0x3e   :  { %59 = vsyncpa [#allocation4], 1 }

</bundles_post_ra>
